<compile_context>
chip_gen: v6e
topology: v6e:2x2x1
jax: 0.10.0
libtpu: 0.0.40
codegen_flags: <defaults>
</compile_context>

<pallas_src>
import functools
import math

import jax
import jax.numpy as jnp
from jax.experimental import pallas as pl
from jax.experimental.pallas import tpu as pltpu


def _round_up(n: int, m: int) -> int:
    return ((n + m - 1) // m) * m


# ------------------------------ Pallas kernel ------------------------------ #

def value_net_kernel(x_ref, w_ref, b_ref, out_ref, *, a_dim):
    """Fused ValueNet forward for one batch tile.

    x_ref  : (Bt, D)    flattened boards, producer dtype (int8 / f32 / ...)
    w_ref  : (D, Naug)  folded conv+linear weights (kq cols pre-scaled by
                        1/sqrt(dot_dim)) + piece-count column + zero pad
    b_ref  : (Naug, 1)  folded bias column (f32, zero for piece/pad columns)
    out_ref: (1, Bt)    squashed value per sample (batch on lanes)
    """
    # VPU convert right after the load (hides under the DMA); MXU needs f32.
    x = x_ref[...].astype(jnp.float32)

    # Single MXU pass: scaled key/query logits | value proj | piece count.
    y = jnp.dot(x, w_ref[...], preferred_element_type=jnp.float32)   # (Bt, Naug)

    # Batch on the LANE axis for the epilogue: reductions become sublane
    # reduces, the output store is lane-dense, and the bias add (done AFTER
    # the transpose) only touches dense vregs.
    yt = y.T + b_ref[...]                                  # (Naug, Bt)

    logits = yt[0:a_dim, :]                                # (A, Bt) pre-scaled
    vals = yt[a_dim:2 * a_dim, :]                          # (A, Bt)
    piece_sum = yt[2 * a_dim:2 * a_dim + 1, :]             # (1, Bt) = sum x[:,1:]

    # softmax over the attention axis (sublanes) fused with the weighted sum.
    m = jnp.max(logits, axis=0, keepdims=True)
    e = jnp.exp(logits - m)
    denom = jnp.sum(e, axis=0, keepdims=True)
    num = jnp.sum(e * vals, axis=0, keepdims=True)
    value = num * pl.reciprocal(denom, approx=True)        # (1, Bt)  EUP recip

    # empty_masks = (x[:, 1:].sum(...) == 0); "< 0.5" is robust to rounding.
    value = jnp.where(piece_sum < 0.5, 0.0, value)

    # value / (1 + max(value, -value)) == value / (1 + |value|)
    out_ref[...] = value * pl.reciprocal(1.0 + jnp.abs(value), approx=True)


# --------------------------- offline weight folding ------------------------ #

def fold_params(params, *, n_rows, n_cols):
    """Fold Conv2d(Cin,Cout,k,pad=k//2) + both Linear layers + softmax scale
    into one affine map  x.reshape(B,-1) @ W_aug + b_aug.

    The pre-softmax part of ValueNet is linear in x, so it collapses exactly;
    computed once via jax.jacobian of the affine reference map (matches the
    nn.Module semantics by construction).  Done offline, never per forward.
    """
    Wc, bc = params["Wc"], params["bc"]
    Wkq, bkq = params["Wkq"], params["bkq"]
    Wv, bv = params["Wv"], params["bv"]
    c_out, c_in, _, _ = Wc.shape
    a_dim = Wkq.shape[0]
    rc = n_rows * n_cols
    d = c_in * rc
    dot_dim = c_out * rc
    inv_sqrt = 1.0 / math.sqrt(float(dot_dim))

    def pre_softmax(x1):                                   # (Cin,R,C) -> (2A,)
        emb = jax.lax.conv_general_dilated(
            x1[None], Wc, window_strides=(1, 1), padding="SAME",
            dimension_numbers=("NCHW", "OIHW", "NCHW"))[0] + bc[:, None, None]
        flat = emb.reshape(-1)                             # channel-major flatten
        # 1/sqrt(dot_dim) folded into the key/query columns here (offline).
        return jnp.concatenate([(Wkq @ flat + bkq) * inv_sqrt, Wv @ flat + bv])

    zero = jnp.zeros((c_in, n_rows, n_cols), jnp.float32)
    b_comb = pre_softmax(zero)                                        # (2A,)
    w_comb = jax.jacobian(pre_softmax)(zero).reshape(2 * a_dim, d).T  # (D, 2A)

    # Extra column: ones over channels 1.. -> piece count for the empty mask.
    piece_col = jnp.zeros((d, 1), jnp.float32).at[rc:, :].set(1.0)

    n_aug = _round_up(2 * a_dim + 1, 8)      # pad columns to a sublane multiple
    pad = n_aug - (2 * a_dim + 1)
    w_aug = jnp.concatenate(
        [w_comb, piece_col, jnp.zeros((d, pad), jnp.float32)], axis=1)
    b_aug = jnp.concatenate(
        [b_comb, jnp.zeros((1 + pad,), jnp.float32)]).reshape(n_aug, 1)
    return dict(W=w_aug, b=b_aug, a_dim=a_dim)


# --------------------------------- forward --------------------------------- #

def value_net_forward(x, folded, *, block_b=8192):
    """x: (B, Cin, R, C) in the producer's dtype (int8 recommended; f32 works).

    Returns (B,) f32 squashed values matching the nn.Module.  No wrapper-side
    dtype casts: x is streamed as-is and converted on-chip after the load.
    """
    B = x.shape[0]
    d = x.shape[1] * x.shape[2] * x.shape[3]
    a_dim = folded["a_dim"]
    w = folded["W"]                    # (D, Naug) f32, resident in VMEM
    b = folded["b"]                    # (Naug, 1) f32, resident in VMEM
    n_aug = w.shape[1]

    x_flat = x.reshape(B, d)           # contiguous reshape: free, no cast

    # Batch tile: large (HBM-bound kernel, ~0.35 us fixed per-step overhead),
    # a multiple of 128 (lane-dense (1, bb) output store), and capped so the
    # grid has >= 2 steps whenever B > 128 — v7x then shards the batch tiles
    # across its 2 TensorCores via the "parallel" grid axis.
    block_b = max(128, _round_up(block_b, 128))
    b128 = _round_up(B, 128)
    half = max(128, _round_up((b128 + 1) // 2, 128))
    bb = min(block_b, half)
    b_pad = _round_up(B, bb)
    if b_pad != B:                     # zero pad rows -> empty-board path -> 0
        x_flat = jnp.pad(x_flat, ((0, b_pad - B), (0, 0)))
    n_steps = b_pad // bb

    # Deeper x buffering only pays off for long grids of short steps (v7x).
    if n_steps >= 4:
        x_spec = pl.BlockSpec((bb, d), lambda i: (i, 0),
                              pipeline_mode=pl.Buffered(3))
    else:
        x_spec = pl.BlockSpec((bb, d), lambda i: (i, 0))

    # VMEM budget: default tiles (bb <= 8192) sit well under 32 MiB even for
    # f32 inputs; only very large user-requested tiles need more headroom
    # (~48 MiB; v7x has 64 MiB physical, v5e/v6e have 128 MiB).
    vmem_limit = (48 if bb >= 16384 else 32) * 1024 * 1024

    # TODO(synk): if the producer can store boards transposed as (D, B) in
    # HBM, tile (d, bb) and compute yt = dot(W.T, x_tile) directly, removing
    # the in-kernel transpose (never transpose in this wrapper: extra HBM pass).

    kernel = functools.partial(value_net_kernel, a_dim=a_dim)
    out = pl.pallas_call(
        kernel,
        out_shape=jax.ShapeDtypeStruct((1, b_pad), jnp.float32),
        grid_spec=pltpu.PrefetchScalarGridSpec(
            num_scalar_prefetch=0,
            grid=(n_steps,),
            in_specs=[
                x_spec,                                      # streamed boards
                pl.BlockSpec((d, n_aug), lambda i: (0, 0)),  # resident weights
                pl.BlockSpec((n_aug, 1), lambda i: (0, 0)),  # resident bias col
            ],
            out_specs=pl.BlockSpec((1, bb), lambda i: (0, i)),  # lane-dense
        ),
        compiler_params=pltpu.CompilerParams(
            dimension_semantics=("parallel",),   # v7x: shard batch over 2 TCs
            vmem_limit_bytes=vmem_limit,
        ),
    )(x_flat, w, b)
    return out[0, :B]


# ------------------------- deterministic parameters ------------------------- #

def init_params(key, c_in, c_out, k, n_rows, n_cols):
    dot_dim = c_out * n_rows * n_cols
    a_dim = c_out
    ks = jax.random.split(key, 6)
    sc = 1.0 / math.sqrt(c_in * k * k)
    sl = 1.0 / math.sqrt(dot_dim)
    return dict(
        Wc=jax.random.uniform(ks[0], (c_out, c_in, k, k), jnp.float32, -sc, sc),
        bc=jax.random.uniform(ks[1], (c_out,), jnp.float32, -sc, sc),
        Wkq=jax.random.uniform(ks[2], (a_dim, dot_dim), jnp.float32, -sl, sl),
        bkq=jax.random.uniform(ks[3], (a_dim,), jnp.float32, -sl, sl),
        Wv=jax.random.uniform(ks[4], (a_dim, dot_dim), jnp.float32, -sl, sl),
        bv=jax.random.uniform(ks[5], (a_dim,), jnp.float32, -sl, sl),
    )


# ----------------------------- pure-JAX reference --------------------------- #

def reference_forward(x, params):
    Wc, bc = params["Wc"], params["bc"]
    Wkq, bkq = params["Wkq"], params["bkq"]
    Wv, bv = params["Wv"], params["bv"]
    emb = jax.lax.conv_general_dilated(
        x, Wc, window_strides=(1, 1), padding="SAME",
        dimension_numbers=("NCHW", "OIHW", "NCHW")) + bc[None, :, None, None]
    flat = emb.reshape(x.shape[0], -1)
    dot_dim = Wkq.shape[1]
    attn = jax.nn.softmax((flat @ Wkq.T + bkq) / math.sqrt(dot_dim), axis=1)
    vals = flat @ Wv.T + bv
    value = jnp.sum(attn * vals, axis=1)
    empty = jnp.sum(x[:, 1:, :, :], axis=(1, 2, 3)) == 0
    value = jnp.where(empty, jnp.zeros_like(value), value)
    return value / (1.0 + jnp.maximum(value, -value))


if __name__ == "__main__":
    C_IN, N_ROWS, N_COLS = 3, 6, 7          # connect-four board
    KSIZE, C_OUT = 3, 8

    key = jax.random.PRNGKey(0)
    k_x, k_x2, k_x3, k_p = jax.random.split(key, 4)
    params = init_params(k_p, C_IN, C_OUT, KSIZE, N_ROWS, N_COLS)
    folded = fold_params(params, n_rows=N_ROWS, n_cols=N_COLS)

    # 1) Small int8 batch; sample 0 is an empty board -> masked value must be 0.
    B = 2
    x = jax.random.bernoulli(k_x, 0.3, (B, C_IN, N_ROWS, N_COLS)).astype(jnp.int8)
    x = x.at[0, 1:, :, :].set(0)
    out = jax.block_until_ready(value_net_forward(x, folded))
    ref = reference_forward(x.astype(jnp.float32), params)
    assert out.shape == (B,)
    assert jnp.allclose(out, ref, atol=5e-3, rtol=5e-3), (out, ref)

    # 2) Ragged int8 batch: exercises zero pad rows + a 2-step parallel grid
    #    (v7x: one tile per TensorCore).
    B2 = 1000
    x2 = jax.random.bernoulli(k_x2, 0.3, (B2, C_IN, N_ROWS, N_COLS)).astype(jnp.int8)
    out2 = jax.block_until_ready(value_net_forward(x2, folded))
    ref2 = reference_forward(x2.astype(jnp.float32), params)
    assert out2.shape == (B2,)
    assert jnp.allclose(out2, ref2, atol=5e-3, rtol=5e-3), \
        float(jnp.max(jnp.abs(out2 - ref2)))

    # 3) f32 boards (no wrapper cast either way) with a long grid: exercises
    #    the Buffered(3) x stream and the many-step parallel schedule.
    B3 = 3000
    x3 = jax.random.bernoulli(k_x3, 0.3, (B3, C_IN, N_ROWS, N_COLS)).astype(jnp.float32)
    out3 = jax.block_until_ready(value_net_forward(x3, folded, block_b=512))
    ref3 = reference_forward(x3, params)
    assert out3.shape == (B3,)
    assert jnp.allclose(out3, ref3, atol=5e-3, rtol=5e-3), \
        float(jnp.max(jnp.abs(out3 - ref3)))

    print("KERNEL_OK")
</pallas_src>

<mosaic_0001>
module attributes {stable_mosaic.version = 11 : i64} {
  func.func @value_net_kernel(%arg0: i32, %arg1: memref<128x126xi8, #tpu.memory_space<vmem>>, %arg2: memref<126x24xf32, #tpu.memory_space<vmem>>, %arg3: memref<24x1xf32, #tpu.memory_space<vmem>>, %arg4: memref<1x128xf32, #tpu.memory_space<vmem>>) attributes {dimension_semantics = [#tpu.dimension_semantics<parallel>], iteration_bounds = array<i64: 1>, scalar_prefetch = 0 : i64, scratch_operands = 0 : i64, tpu.core_type = #tpu.core_type<tc>, window_params = [{transform_indices = @transform_0, window_bounds = array<i64: 128, 126>}, {pipeline_mode = #tpu.pipeline_mode<synchronous>, transform_indices = @transform_1, window_bounds = array<i64: 126, 24>}, {pipeline_mode = #tpu.pipeline_mode<synchronous>, transform_indices = @transform_2, window_bounds = array<i64: 24, 1>}, {transform_indices = @transform_3, window_bounds = array<i64: 1, 128>}]} {
    %c0 = arith.constant 0 : index
    %c0_0 = arith.constant 0 : index
    %0 = vector.load %arg1[%c0, %c0_0] : memref<128x126xi8, #tpu.memory_space<vmem>>, vector<128x126xi8>
    %1 = arith.sitofp %0 : vector<128x126xi8> to vector<128x126xf32>
    %c0_1 = arith.constant 0 : index
    %c0_2 = arith.constant 0 : index
    %2 = vector.load %arg2[%c0_1, %c0_2] : memref<126x24xf32, #tpu.memory_space<vmem>>, vector<126x24xf32>
    %cst = arith.constant dense<0.000000e+00> : vector<128x24xf32>
    %3 = tpu.matmul %1, %2, %cst {dimension_numbers = #tpu.dot_dimension_numbers<[1], [0], [0], [1], [0, 0, 1, 1], [], []>} : vector<128x126xf32>, vector<126x24xf32>, vector<128x24xf32> -> vector<128x24xf32>
    %4 = tpu.transpose %3, [1, 0] : vector<128x24xf32> -> vector<24x128xf32>
    %c0_3 = arith.constant 0 : index
    %c0_4 = arith.constant 0 : index
    %5 = vector.load %arg3[%c0_3, %c0_4] : memref<24x1xf32, #tpu.memory_space<vmem>>, vector<24x1xf32>
    %6 = vector.broadcast %5 : vector<24x1xf32> to vector<24x128xf32>
    %7 = arith.addf %4, %6 : vector<24x128xf32>
    %8 = vector.extract_strided_slice %7 {offsets = [0, 0], sizes = [8, 128], strides = [1, 1]} : vector<24x128xf32> to vector<8x128xf32>
    %9 = vector.extract_strided_slice %7 {offsets = [8, 0], sizes = [8, 128], strides = [1, 1]} : vector<24x128xf32> to vector<8x128xf32>
    %10 = vector.extract_strided_slice %7 {offsets = [16, 0], sizes = [1, 128], strides = [1, 1]} : vector<24x128xf32> to vector<1x128xf32>
    %cst_5 = arith.constant dense<0xFF800000> : vector<128xf32>
    %11 = vector.multi_reduction <maximumf>, %8, %cst_5 [0] : vector<8x128xf32> to vector<128xf32>
    %12 = vector.shape_cast %11 : vector<128xf32> to vector<1x128xf32>
    %13 = vector.broadcast %12 : vector<1x128xf32> to vector<8x128xf32>
    %14 = arith.subf %8, %13 : vector<8x128xf32>
    %15 = math.exp %14 : vector<8x128xf32>
    %cst_6 = arith.constant dense<0.000000e+00> : vector<128xf32>
    %16 = vector.multi_reduction <add>, %15, %cst_6 [0] : vector<8x128xf32> to vector<128xf32>
    %17 = vector.shape_cast %16 : vector<128xf32> to vector<1x128xf32>
    %18 = arith.mulf %15, %9 : vector<8x128xf32>
    %cst_7 = arith.constant dense<0.000000e+00> : vector<128xf32>
    %19 = vector.multi_reduction <add>, %18, %cst_7 [0] : vector<8x128xf32> to vector<128xf32>
    %20 = vector.shape_cast %19 : vector<128xf32> to vector<1x128xf32>
    %21 = tpu.reciprocal %17 {approx = true} : vector<1x128xf32> -> vector<1x128xf32>
    %22 = arith.mulf %20, %21 : vector<1x128xf32>
    %cst_8 = arith.constant 5.000000e-01 : f32
    %23 = vector.broadcast %cst_8 : f32 to vector<1x128xf32>
    %24 = arith.cmpf olt, %10, %23 : vector<1x128xf32>
    %cst_9 = arith.constant 0.000000e+00 : f32
    %25 = vector.broadcast %cst_9 : f32 to vector<1x128xf32>
    %26 = arith.select %24, %25, %22 : vector<1x128xi1>, vector<1x128xf32>
    %27 = math.absf %26 : vector<1x128xf32>
    %cst_10 = arith.constant 1.000000e+00 : f32
    %28 = vector.broadcast %cst_10 : f32 to vector<1x128xf32>
    %29 = arith.addf %28, %27 : vector<1x128xf32>
    %30 = tpu.reciprocal %29 {approx = true} : vector<1x128xf32> -> vector<1x128xf32>
    %31 = arith.mulf %26, %30 : vector<1x128xf32>
    %c0_11 = arith.constant 0 : index
    %c0_12 = arith.constant 0 : index
    %32 = vector.load %arg4[%c0_11, %c0_12] : memref<1x128xf32, #tpu.memory_space<vmem>>, vector<1x128xf32>
    tpu.vector_store %arg4[%c0_11, %c0_12], %31 {strides = array<i32>} : memref<1x128xf32, #tpu.memory_space<vmem>>, vector<1x128xf32>,
    return
  }
  func.func @transform_0(%arg0: i32) -> (i32, i32) {
    %c0_i32 = arith.constant 0 : i32
    %c0_i32_0 = arith.constant 0 : i32
    return %arg0, %c0_i32 : i32, i32
  }
  func.func @transform_1(%arg0: i32) -> (i32, i32) {
    %c0_i32 = arith.constant 0 : i32
    %c0_i32_0 = arith.constant 0 : i32
    %c0_i32_1 = arith.constant 0 : i32
    return %c0_i32, %c0_i32_0 : i32, i32
  }
  func.func @transform_2(%arg0: i32) -> (i32, i32) {
    %c0_i32 = arith.constant 0 : i32
    %c0_i32_0 = arith.constant 0 : i32
    %c0_i32_1 = arith.constant 0 : i32
    return %c0_i32, %c0_i32_0 : i32, i32
  }
  func.func @transform_3(%arg0: i32) -> (i32, i32) {
    %c0_i32 = arith.constant 0 : i32
    %c0_i32_0 = arith.constant 0 : i32
    return %c0_i32, %arg0 : i32, i32
  }
}

</mosaic_0001>

<bundles_post_ra>
// kernel: tpu_custom_call.1
= control target key start
LH: loop header
LB: loop body
LE: loop exit
PB: predicated region body
PF: predicated region fallthrough
CT: control target
= control target key end

     0   :  { %vm116_vm0 = vcmask 1045504   ;;  %vm67_vm1 = vcmask 1031168   ;;  %s648_s0 = inlined_call_operand.vmem [shape: s8[128,126], index: 0, kind: input, shape index: {}]   ;;  %s649_s1 = inlined_call_operand.vmem [shape: f32[126,24], index: 1, kind: input, shape index: {}]   ;;  %s650_s2 = inlined_call_operand.vmem [shape: f32[24,1], index: 2, kind: input, shape index: {}]   ;;  %s651_s3 = inlined_call_operand.hbm [shape: f32[1,128], index: 3, kind: output, shape index: {}]  }
   0x1   :  { %v66_v0 = vld [vmem:[%s649_s1 + $0x78] sm:$0x3f]  ;;  %v65_v1 = vld [vmem:[%s649_s1 + $0x70] sm:$0xff]  ;;  %v64_v2 = vld [vmem:[%s649_s1 + $0x68] sm:$0xff] }
   0x2   :  { %412 = vmatprep.subr.msk.mxu0 %vm116_vm0, %v66_v0  ;;  %468 = vmatprep.subr.msk.mxu1 %vm116_vm0, %v66_v0  ;;  %v63_v3 = vld [vmem:[%s649_s1 + $0x60] sm:$0xff]  ;;  %v62_v5 = vld [vmem:[%s649_s1 + $0x58] sm:$0xff] }
   0x3   :  { %413 = vmatpush3.msk.msra.mxu0 %vm116_vm0, %v66_v0  ;;  %484 = vmatpush3.msk.msra.mxu1 %vm116_vm0, %v66_v0  ;;  %v569_v4 = vld [vmem:[%s648_s0] sm:$0xff] }
   0x4   :  { %414 = vmatprep.subr.mxu0 %v65_v1  ;;  %469 = vmatprep.subr.mxu1 %v65_v1  ;;  %v19_v6 = vunpack.c.0.s8 %v569_v4 }
   0x5   :  { %415 = vmatpush3.msra.mxu0 %v65_v1  ;;  %485 = vmatpush3.msra.mxu1 %v65_v1 }
   0x6   :  { %416 = vmatprep.subr.mxu0 %v64_v2  ;;  %470 = vmatprep.subr.mxu1 %v64_v2 }
   0x7   :  { %417 = vmatpush3.msra.mxu0 %v64_v2  ;;  %486 = vmatpush3.msra.mxu1 %v64_v2 }
   0x8   :  { %418 = vmatprep.subr.mxu0 %v63_v3  ;;  %471 = vmatprep.subr.mxu1 %v63_v3 }
   0x9   :  { %8 = vsyncpa [#allocation3], 0  ;;  %419 = vmatpush3.msra.mxu0 %v63_v3  ;;  %v61_v7 = vld [vmem:[%s649_s1 + $0x50] sm:$0xff]  ;;  %v35_v8 = vcvt.s32.f32 %v19_v6  ;;  %487 = vmatpush3.msra.mxu1 %v63_v3  ;;  %v60_v9 = vld [vmem:[%s649_s1 + $0x48] sm:$0xff]  ;;  %v20_v18 = vunpack.c.1.s8 %v569_v4  ;;  %v21_v20 = vunpack.c.2.s8 %v569_v4  ;;  %v22_v27 = vunpack.c.3.s8 %v569_v4 }
   0xa   :  { %420 = vmatprep.subr.mxu0 %v62_v5  ;;  %472 = vmatprep.subr.mxu1 %v62_v5  ;;  %v59_v10 = vld [vmem:[%s649_s1 + $0x40] sm:$0xff]  ;;  %v58_v11 = vld [vmem:[%s649_s1 + $0x38] sm:$0xff]  ;;  %v57_v12 = vld [vmem:[%s649_s1 + $0x30] sm:$0xff]  ;;  %v532_v43 = vmov 0  }
   0xb   :  { %421 = vmatpush3.msra.mxu0 %v62_v5  ;;  %444 = vmatprep.mubr.msk.f32.mxu0 %vm67_vm1, %v35_v8  ;;  %v56_v13 = vld [vmem:[%s649_s1 + $0x28] sm:$0xff]  ;;  %v55_v14 = vld [vmem:[%s649_s1 + $0x20] sm:$0xff]  ;;  %v54_v15 = vld [vmem:[%s649_s1 + $0x18] sm:$0xff]  ;;  %v36_v26 = vcvt.s32.f32 %v20_v18  ;;  %v37_v29 = vcvt.s32.f32 %v21_v20  ;;  %v38_v36 = vcvt.s32.f32 %v22_v27 }
   0xc   :  { %422 = vmatprep.subr.mxu0 %v61_v7  ;;  %488 = vmatpush3.msra.mxu1 %v62_v5  ;;  %v17_v16 = vld [vmem:[%s648_s0 + $0x10] sm:$0xff]  ;;  %v52_v19 = vld [vmem:[%s649_s1 + $0x8] sm:$0xff]  ;;  %v51_v24 = vld [vmem:[%s649_s1] sm:$0xff] }
   0xd   :  { %423 = vmatpush3.msra.mxu0 %v61_v7  ;;  %473 = vmatprep.subr.mxu1 %v61_v7  ;;  %v53_v17 = vld [vmem:[%s649_s1 + $0x10] sm:$0xff]  ;;  %v27_v21 = vunpack.c.0.s8 %v17_v16  ;;  %v16_v22 = vld [vmem:[%s648_s0 + $0x8] sm:$0xff]  ;;  %v28_v23 = vunpack.c.1.s8 %v17_v16  ;;  %v29_v25 = vunpack.c.2.s8 %v17_v16  ;;  %v18_v28 = vld [vmem:[%s648_s0 + $0x18] sm:$0xff]  ;;  %v30_v33 = vunpack.c.3.s8 %v17_v16 }
   0xe   :  { %424 = vmatprep.subr.mxu0 %v60_v9  ;;  %489 = vmatpush3.msra.mxu1 %v61_v7  ;;  %v23_v30 = vunpack.c.0.s8 %v16_v22  ;;  %v31_v35 = vunpack.c.0.s8 %v18_v28  ;;  %v24_v37 = vunpack.c.1.s8 %v16_v22  ;;  %v297_v38 = vld [vmem:[%s650_s2] sm:$0xff]  ;;  %v25_v40 = vunpack.c.2.s8 %v16_v22  ;;  %v298_v54 = vld [vmem:[%s650_s2 + $0x8] sm:$0xff]  ;;  %v299_v55 = vld [vmem:[%s650_s2 + $0x10] sm:$0xff]  ;;  %s533_s2 = smov [#allocation2]  }
   0xf   :  { %425 = vmatpush3.msra.mxu0 %v60_v9  ;;  %474 = vmatprep.subr.mxu1 %v60_v9  ;;  %v43_v31 = vcvt.s32.f32 %v27_v21  ;;  %v44_v32 = vcvt.s32.f32 %v28_v23  ;;  %v45_v34 = vcvt.s32.f32 %v29_v25  ;;  %v46_v41 = vcvt.s32.f32 %v30_v33  ;;  %s355_s29 = sshll.u32 %s533_s2, 4  ;;  %s356_s29 = int_to_ptr.vmem [resolvable:$true] %s355_s29 }
  0x10   :  { %426 = vmatprep.subr.mxu0 %v59_v10  ;;  %490 = vmatpush3.msra.mxu1 %v60_v9  ;;  %v39_v39 = vcvt.s32.f32 %v23_v30  ;;  %v32_v42 = vunpack.c.1.s8 %v18_v28  ;;  %v47_v44 = vcvt.s32.f32 %v31_v35  ;;  %v33_v45 = vunpack.c.2.s8 %v18_v28  ;;  %s510_s30 = scalar_lea.vmem %s356_s29, 16  ;;  %s514_s4 = scalar_lea.vmem %s356_s29, 32 }
  0x11   :  { %427 = vmatpush3.msra.mxu0 %v59_v10  ;;  %475 = vmatprep.subr.mxu1 %v59_v10  ;;  %v40_v46 = vcvt.s32.f32 %v24_v37  ;;  %v26_v47 = vunpack.c.3.s8 %v16_v22  ;;  %v41_v48 = vcvt.s32.f32 %v25_v40  ;;  %v34_v50 = vunpack.c.3.s8 %v18_v28  ;;  %p511_p0 = scmp.ne.s32.totalorder %s356_s29, %s510_s30  ;;  %p515_p1 = scmp.lt.s32.totalorder %s356_s29, %s356_s29 }
  0x12   :  { %428 = vmatprep.subr.mxu0 %v58_v11  ;;  %491 = vmatpush3.msra.mxu1 %v59_v10  ;;  %v48_v49 = vcvt.s32.f32 %v32_v42  ;;  %v49_v51 = vcvt.s32.f32 %v33_v45  ;;  %p516_p2 = scmp.lt.s32.totalorder %s514_s4, %s510_s30 }
  0x13   :  { %429 = vmatpush3.msra.mxu0 %v58_v11  ;;  %476 = vmatprep.subr.mxu1 %v58_v11  ;;  %v42_v52 = vcvt.s32.f32 %v26_v47  ;;  %v50_v53 = vcvt.s32.f32 %v34_v50 }
  0x14   :  { %430 = vmatprep.subr.mxu0 %v57_v12  ;;  %492 = vmatpush3.msra.mxu1 %v58_v11  ;;  %p517_p3 = por %p516_p2, %p515_p1 }
  0x15   :  { %431 = vmatpush3.msra.mxu0 %v57_v12  ;;  %477 = vmatprep.subr.mxu1 %v57_v12 }
  0x16   :  { %432 = vmatprep.subr.mxu0 %v56_v13  ;;  %493 = vmatpush3.msra.mxu1 %v57_v12  ;;  %p518_p4 = pnand %p517_p3, %p511_p0 }
  0x17   :  { %433 = vmatpush3.msra.mxu0 %v56_v13  ;;  %478 = vmatprep.subr.mxu1 %v56_v13 }
  0x18   :  { %434 = vmatprep.subr.mxu0 %v55_v14  ;;  %494 = vmatpush3.msra.mxu1 %v56_v13 }
  0x19   :  { %435 = vmatpush3.msra.mxu0 %v55_v14  ;;  %479 = vmatprep.subr.mxu1 %v55_v14 }
  0x1a   :  { %436 = vmatprep.subr.mxu0 %v54_v15  ;;  %495 = vmatpush3.msra.mxu1 %v55_v14 }
  0x1b   :  { %437 = vmatpush3.msra.mxu0 %v54_v15  ;;  %480 = vmatprep.subr.mxu1 %v54_v15 }
  0x1c   :  { %438 = vmatprep.subr.mxu0 %v53_v17  ;;  %496 = vmatpush3.msra.mxu1 %v54_v15 }
  0x1d   :  { %439 = vmatpush3.msra.mxu0 %v53_v17  ;;  %481 = vmatprep.subr.mxu1 %v53_v17 }
  0x1e   :  { %440 = vmatprep.subr.mxu0 %v52_v19  ;;  %497 = vmatpush3.msra.mxu1 %v53_v17 }
  0x1f   :  { %441 = vmatpush3.msra.mxu0 %v52_v19  ;;  %482 = vmatprep.subr.mxu1 %v52_v19 }
  0x20   :  { %442 = vmatprep.subr.mxu0 %v51_v24  ;;  %498 = vmatpush3.msra.mxu1 %v52_v19 }
  0x21   :  { %443 = vmatpush3.msra.mxu0 %v51_v24  ;;  %483 = vmatprep.subr.mxu1 %v51_v24 }
  0x22   :  { %445 = vmatmul.mubr.msk.f32.vlgmr.msra.gmra.mxu0 %vm67_vm1, %v36_v26  ;;  %499 = vmatpush3.msra.mxu1 %v51_v24 }
  0x23   :  { %447 = vmatprep.mubr.msk.f32.mxu0 %vm67_vm1, %v37_v29  ;;  %456 = vmatprep.mubr.msk.f32.mxu1 %vm67_vm1, %v43_v31 }
  0x24   :  { %457 = vmatmul.mubr.msk.f32.vlgmr.msra.gmra.mxu1 %vm67_vm1, %v44_v32  ;;  %502 = vset.pattern.permute.xlu0 %v532_v43 }
  0x25   :  { %459 = vmatprep.mubr.msk.f32.mxu1 %vm67_vm1, %v45_v34  ;;  %302 = vperm.xlu0 %502, %v297_v38  }
  0x26   :  { %448 = vmatmul.mubr.msk.f32.gmra.mxu0 %vm67_vm1, %v38_v36  ;;  %503 = vset.pattern.permute.xlu1 %v532_v43 }
  0x27   :  { %450 = vmatprep.mubr.msk.f32.mxu0 %vm67_vm1, %v39_v39  ;;  %307 = vperm.xlu1 %503, %v298_v54  }
  0x28   :  { %460 = vmatmul.mubr.msk.f32.gmra.mxu1 %vm67_vm1, %v46_v41 }
  0x29   :  { %462 = vmatprep.mubr.msk.f32.mxu1 %vm67_vm1, %v47_v44 }
  0x2a   :  { %451 = vmatmul.mubr.msk.f32.gmra.mxu0 %vm67_vm1, %v40_v46 }
  0x2b   :  { %453 = vmatprep.mubr.msk.f32.mxu0 %vm67_vm1, %v41_v48  ;;  %312 = vperm.xlu1 %503, %v299_v55  }
  0x2c   :  { %463 = vmatmul.mubr.msk.f32.gmra.mxu1 %vm67_vm1, %v48_v49 }
  0x2d   :  { %465 = vmatprep.mubr.msk.f32.mxu1 %vm67_vm1, %v49_v51 }
  0x2e   :  { %454 = vmatmul.mubr.msk.f32.gmra.mxu0 %vm67_vm1, %v42_v52 }
  0x30   :  { %466 = vmatmul.mubr.msk.f32.gmra.mxu1 %vm67_vm1, %v50_v53 }
  0xa0   :  { %v303_v8 = vpop.permute.xlu0 %302 }
  0xa2   :  { %v308_v19 = vpop.permute.xlu1 %307 }
  0xa6   :  { %v313_v34 = vpop.permute.xlu1 %312 }
  0xe2   :  { %v446_v56 = vpop.f32.mrf.mxu0 }
  0xe4   :  { %v186_v57 = vpop.f32.mrf.mxu0  ;;  %v458_v0 = vpop.f32.mrf.mxu1 }
  0xe5   :  { %265 = vxpose.xlu0.b32.start [1/16] (narrow) %v186_v57, 24 }
  0xe6   :  { %v449_v58 = vpop.f32.mrf.mxu0  ;;  %v226_v1 = vpop.f32.mrf.mxu1 }
  0xe8   :  { %v196_v59 = vpop.f32.mrf.mxu0  ;;  %v461_v2 = vpop.f32.mrf.mxu1 }
  0xe9   :  { %266 = vxpose.xlu0.b32.cont [2/16] (narrow) %v446_v56, 24 }
  0xea   :  { %v452_v60 = vpop.f32.mrf.mxu0  ;;  %v236_v3 = vpop.f32.mrf.mxu1 }
  0xec   :  { %v206_v61 = vpop.f32.mrf.mxu0  ;;  %v464_v4 = vpop.f32.mrf.mxu1 }
  0xed   :  { %267 = vxpose.xlu0.b32.cont [3/16] (narrow) %v196_v59, 24 }
  0xee   :  { %v455_v62 = vpop.f32.mrf.mxu0  ;;  %v246_v5 = vpop.f32.mrf.mxu1 }
  0xf0   :  { %v216_v63 = vpop.f32.mrf.mxu0  ;;  %v467_v6 = vpop.f32.mrf.mxu1 }
  0xf1   :  { %268 = vxpose.xlu0.b32.cont [4/16] (narrow) %v449_v58, 24 }
  0xf2   :  { %v256_v7 = vpop.f32.mrf.mxu1 }
  0xf5   :  { %269 = vxpose.xlu0.b32.cont [5/16] (narrow) %v206_v61, 24 }
  0xf9   :  { %270 = vxpose.xlu0.b32.cont [6/16] (narrow) %v452_v60, 24 }
  0xfd   :  { %271 = vxpose.xlu0.b32.cont [7/16] (narrow) %v216_v63, 24 }
 0x101   :  { %272 = vxpose.xlu0.b32.cont [8/16] (narrow) %v455_v62, 24 }
 0x105   :  { %273 = vxpose.xlu0.b32.cont [9/16] (narrow) %v226_v1, 24 }
 0x109   :  { %274 = vxpose.xlu0.b32.cont [10/16] (narrow) %v458_v0, 24 }
 0x10d   :  { %275 = vxpose.xlu0.b32.cont [11/16] (narrow) %v236_v3, 24 }
 0x111   :  { %276 = vxpose.xlu0.b32.cont [12/16] (narrow) %v461_v2, 24 }
 0x115   :  { %277 = vxpose.xlu0.b32.cont [13/16] (narrow) %v246_v5, 24 }
 0x119   :  { %278 = vxpose.xlu0.b32.cont [14/16] (narrow) %v464_v4, 24 }
 0x11d   :  { %279 = vxpose.xlu0.b32.cont [15/16] (narrow) %v256_v7, 24 }
 0x121   :  { %280 = vxpose.xlu0.b32.end [16/16] (narrow) %v467_v6, 24 }
 0x161   :  { %v281_v9 = vpop.trf.xlu0 }
 0x162   :  { %v315_v10 = vadd.f32 %v303_v8, %v281_v9 }
 0x164   :  { %v318_v11 = vrot.slane %v315_v10, 4 }
 0x165   :  { %v282_v20 = vpop.trf.xlu0 }
 0x166   :  { %v319_v12 = vmax.f32 %v315_v10, %v318_v11  ;;  %v316_v21 = vadd.f32 %v308_v19, %v282_v20 }
 0x168   :  { %v320_v13 = vrot.slane %v319_v12, 2 }
 0x169   :  { %v283_v36 = vpop.trf.xlu0 }
 0x16a   :  { %v321_v14 = vmax.f32 %v319_v12, %v320_v13  ;;  %v317_v37 = vadd.f32 %v313_v34, %v283_v36 }
 0x16c   :  { %v322_v15 = vrot.slane %v321_v14, 1  ;;  %vm342_vm2 = vcmp.lt.f32.partialorder %v317_v37, 0.5 }
 0x16e   :  { %v323_v16 = vmax.f32 %v321_v14, %v322_v15 }
 0x170   :  { %v324_v17 = vsub.f32 %v315_v10, %v323_v16 }
 0x172   :  { %v325_v18 = vmul.f32 1.442695, %v324_v17 }
 0x174   :  { %504 = vpow2.f32 %v325_v18 }
 0x181   :  { %v505_v22 = vpop.eup %504 }
 0x182   :  { %v333_v23 = vmul.f32 %v505_v22, %v316_v21  ;;  %v327_v24 = vrot.slane %v505_v22, 4 }
 0x184   :  { %v328_v25 = vadd.f32 %v505_v22, %v327_v24  ;;  %v334_v26 = vrot.slane %v333_v23, 4 }
 0x186   :  { %v329_v27 = vrot.slane %v328_v25, 2  ;;  %v335_v29 = vadd.f32 %v334_v26, %v333_v23 }
 0x188   :  { %v330_v28 = vadd.f32 %v329_v27, %v328_v25  ;;  %v336_v32 = vrot.slane %v335_v29, 2 }
 0x18a   :  { %v331_v30 = vrot.slane %v330_v28, 1  ;;  %v337_v33 = vadd.f32 %v336_v32, %v335_v29 }
 0x18c   :  { %v332_v31 = vadd.f32 %v331_v30, %v330_v28  ;;  %v338_v35 = vrot.slane %v337_v33, 1 }
 0x18e   :  { %506 = vrcp.f32 %v332_v31  ;;  %v339_v38 = vadd.f32 %v338_v35, %v337_v33 }
 0x19b   :  { %v507_v39 = vpop.eup %506 }
 0x19c   :  { %v341_v40 = vmul.f32 %v507_v39, %v339_v38 }
 0x19e   :  { %v343_v41 = vsel %vm342_vm2, 0.0, %v341_v40 }
 0x19f   :  { %v344_v42 = vand.u32 2147483647, %v343_v41 }
 0x1a1   :  { %v345_v43 = vadd.f32 1.0, %v344_v42 }
 0x1a3   :  { %508 = vrcp.f32 %v345_v43 }
 0x1b0   :  { %v509_v44 = vpop.eup %508 }
 0x1b1   :  { %v347_v45 = vmul.f32 %v509_v44, %v343_v41 }
 0x1b3   :  { %348 = vst [vmem:[#allocation2] sm:$0x1] %v347_v45 }
 0x1b4   :  { %521 = shalt.err (!%p518_p4)
}
 0x1b5   :  { %358 = dma.vmem_to_hbm [thread:$0]  %s356_s29, 16, %s651_s3, [#allocation3]  }
 0x1b6   :  { %530 = dma.done.wait [#allocation3], 16  }
 0x1b7   :  { %531 = vsyncadd [#allocation3], 4294967280 }
 0x1b8   :  { %362 = vsyncpa [#allocation3], 1 }

</bundles_post_ra>
